<compile_context>
chip_gen: v6e
topology: v6e:2x2x1
jax: 0.10.0
libtpu: 0.0.40
codegen_flags: <defaults>
</compile_context>

<pallas_src>
import functools

import jax
import jax.numpy as jnp
from jax.experimental import pallas as pl
from jax.experimental.pallas import tpu as pltpu


def multi_head_kernel(q_ref, k_ref, v_ref,
                      wq_ref, bq_ref, wk_ref, bk_ref, wv_ref, bv_ref,
                      w1_ref, b1_ref, o_ref, *, B, S, D, H):
    """Single-step kernel: fused per-head projections, per-head attention
    (static unrolled loop over H heads), fused output projection."""

    def proj(x_ref, w_ref, b_ref):
        # x: (B*S, D), w: (D, H*D) [already (in, out) layout], b: (1, H*D)
        y = jnp.dot(x_ref[...], w_ref[...], preferred_element_type=jnp.float32)
        return y + b_ref[...]

    Qa = proj(q_ref, wq_ref, bq_ref)          # (B*S, H*D)
    Ka = proj(k_ref, wk_ref, bk_ref)
    Va = proj(v_ref, wv_ref, bv_ref)

    # Fold the 1/D score scaling into Q (cheaper than scaling (B,S,S) scores).
    Qa = Qa * (1.0 / D)

    Qa = Qa.reshape(B, S, H * D)
    Ka = Ka.reshape(B, S, H * D)
    Va = Va.reshape(B, S, H * D)

    head_outs = []
    for h in range(H):                         # static unrolled loop over heads
        Qh = Qa[:, :, h * D:(h + 1) * D]
        Kh = Ka[:, :, h * D:(h + 1) * D]
        Vh = Va[:, :, h * D:(h + 1) * D]

        # scores = (Q/D) @ K^T   -> (B, S, S)
        scores = jax.lax.dot_general(
            Qh, Kh,
            dimension_numbers=(((2,), (2,)), ((0,), (0,))),
            preferred_element_type=jnp.float32)

        # F.softmax(..., dim=0): softmax over the BATCH axis (faithful to reference).
        m = jnp.max(scores, axis=0, keepdims=True)
        e = jnp.exp(scores - m)
        p = e / jnp.sum(e, axis=0, keepdims=True)

        attn = jax.lax.dot_general(
            p, Vh,
            dimension_numbers=(((2,), (1,)), ((0,), (0,))),   # (B, S, D)
            preferred_element_type=jnp.float32)
        head_outs.append(attn.reshape(B * S, D))

    # Concatenate heads and do the output projection as ONE matmul.
    cat = jnp.concatenate(head_outs, axis=1)                  # (B*S, H*D)
    out = jnp.dot(cat, w1_ref[...], preferred_element_type=jnp.float32) + b1_ref[...]
    o_ref[...] = out.astype(o_ref.dtype)                      # single store


def multi_head_forward(q, k, v, params):
    B, S, D = q.shape
    H = params["wq"].shape[0]

    # Wrapper-side layout plumbing (free at kernel time):
    #   inputs flattened to (B*S, D); weights packed to (in, out) layout so all
    #   kernel matmuls contract rhs dim 0 with no in-kernel transpose.
    q2 = q.reshape(B * S, D)
    k2 = k.reshape(B * S, D)
    v2 = v.reshape(B * S, D)

    # W_packed[:, h*D:(h+1)*D] == W[h].T   (PyTorch Linear weight is (out, in))
    pack_w = lambda w: jnp.transpose(w, (2, 0, 1)).reshape(D, H * D)
    wq_p = pack_w(params["wq"])
    wk_p = pack_w(params["wk"])
    wv_p = pack_w(params["wv"])
    bq_p = params["bq"].reshape(1, H * D)
    bk_p = params["bk"].reshape(1, H * D)
    bv_p = params["bv"].reshape(1, H * D)
    w1_p = params["w1"].T                   # (H*D, D)
    b1_p = params["b1"].reshape(1, D)

    kernel = functools.partial(multi_head_kernel, B=B, S=S, D=D, H=H)
    vmem = pl.BlockSpec(memory_space=pltpu.MemorySpace.VMEM)

    out2 = pl.pallas_call(
        kernel,
        out_shape=jax.ShapeDtypeStruct((B * S, D), jnp.float32),
        in_specs=[vmem] * 11,
        out_specs=vmem,
    )(q2, k2, v2, wq_p, bq_p, wk_p, bk_p, wv_p, bv_p, w1_p, b1_p)

    return out2.reshape(B, S, D)


def multi_head_ref(q, k, v, params):
    """Pure-JAX reference replicating the PyTorch module semantics."""
    heads = params["wq"].shape[0]
    D = q.shape[-1]
    outs = []
    for h in range(heads):
        Qh = q @ params["wq"][h].T + params["bq"][h]
        Kh = k @ params["wk"][h].T + params["bk"][h]
        Vh = v @ params["wv"][h].T + params["bv"][h]
        scores = jnp.einsum("bsd,btd->bst", Qh, Kh) / D
        p = jax.nn.softmax(scores, axis=0)           # softmax over batch dim, as in reference
        outs.append(jnp.einsum("bst,btd->bsd", p, Vh))
    cat = jnp.concatenate(outs, axis=2)
    return cat @ params["w1"].T + params["b1"]


def init_params(key, d_shape, heads):
    ks = jax.random.split(key, 8)
    s = 1.0 / jnp.sqrt(d_shape)
    s1 = 1.0 / jnp.sqrt(heads * d_shape)
    u = lambda k, shape, sc: jax.random.uniform(k, shape, jnp.float32, -sc, sc)
    return {
        "wq": u(ks[0], (heads, d_shape, d_shape), s),
        "bq": u(ks[1], (heads, d_shape), s),
        "wk": u(ks[2], (heads, d_shape, d_shape), s),
        "bk": u(ks[3], (heads, d_shape), s),
        "wv": u(ks[4], (heads, d_shape, d_shape), s),
        "bv": u(ks[5], (heads, d_shape), s),
        "w1": u(ks[6], (d_shape, heads * d_shape), s1),
        "b1": u(ks[7], (d_shape,), s1),
    }


if __name__ == "__main__":
    B, S, D, HEADS = 2, 8, 32, 3
    key = jax.random.PRNGKey(0)
    kq, kk, kv, kp = jax.random.split(key, 4)
    q = jax.random.normal(kq, (B, S, D), jnp.float32)
    k = jax.random.normal(kk, (B, S, D), jnp.float32)
    v = jax.random.normal(kv, (B, S, D), jnp.float32)
    params = init_params(kp, D, HEADS)

    out = jax.block_until_ready(multi_head_forward(q, k, v, params))
    ref = jax.block_until_ready(multi_head_ref(q, k, v, params))

    assert out.shape == (B, S, D)
    assert jnp.allclose(out, ref, atol=1e-4, rtol=1e-4), float(jnp.max(jnp.abs(out - ref)))
    print("KERNEL_OK")
</pallas_src>

<mosaic_0001>
module attributes {stable_mosaic.version = 11 : i64} {
  func.func @multi_head_kernel(%arg0: memref<16x32xf32, #tpu.memory_space<vmem>>, %arg1: memref<16x32xf32, #tpu.memory_space<vmem>>, %arg2: memref<16x32xf32, #tpu.memory_space<vmem>>, %arg3: memref<32x96xf32, #tpu.memory_space<vmem>>, %arg4: memref<1x96xf32, #tpu.memory_space<vmem>>, %arg5: memref<32x96xf32, #tpu.memory_space<vmem>>, %arg6: memref<1x96xf32, #tpu.memory_space<vmem>>, %arg7: memref<32x96xf32, #tpu.memory_space<vmem>>, %arg8: memref<1x96xf32, #tpu.memory_space<vmem>>, %arg9: memref<96x32xf32, #tpu.memory_space<vmem>>, %arg10: memref<1x32xf32, #tpu.memory_space<vmem>>, %arg11: memref<16x32xf32, #tpu.memory_space<vmem>>) attributes {dimension_semantics = [], scalar_prefetch = 0 : i64, scratch_operands = 0 : i64, tpu.core_type = #tpu.core_type<tc>} {
    %c0 = arith.constant 0 : index
    %c0_0 = arith.constant 0 : index
    %0 = vector.load %arg0[%c0, %c0_0] : memref<16x32xf32, #tpu.memory_space<vmem>>, vector<16x32xf32>
    %c0_1 = arith.constant 0 : index
    %c0_2 = arith.constant 0 : index
    %1 = vector.load %arg3[%c0_1, %c0_2] : memref<32x96xf32, #tpu.memory_space<vmem>>, vector<32x96xf32>
    %cst = arith.constant dense<0.000000e+00> : vector<16x96xf32>
    %2 = tpu.matmul %0, %1, %cst {dimension_numbers = #tpu.dot_dimension_numbers<[1], [0], [0], [1], [0, 0, 1, 1], [], []>} : vector<16x32xf32>, vector<32x96xf32>, vector<16x96xf32> -> vector<16x96xf32>
    %c0_3 = arith.constant 0 : index
    %c0_4 = arith.constant 0 : index
    %3 = vector.load %arg4[%c0_3, %c0_4] : memref<1x96xf32, #tpu.memory_space<vmem>>, vector<1x96xf32>
    %4 = vector.broadcast %3 : vector<1x96xf32> to vector<16x96xf32>
    %5 = arith.addf %2, %4 : vector<16x96xf32>
    %c0_5 = arith.constant 0 : index
    %c0_6 = arith.constant 0 : index
    %6 = vector.load %arg1[%c0_5, %c0_6] : memref<16x32xf32, #tpu.memory_space<vmem>>, vector<16x32xf32>
    %c0_7 = arith.constant 0 : index
    %c0_8 = arith.constant 0 : index
    %7 = vector.load %arg5[%c0_7, %c0_8] : memref<32x96xf32, #tpu.memory_space<vmem>>, vector<32x96xf32>
    %cst_9 = arith.constant dense<0.000000e+00> : vector<16x96xf32>
    %8 = tpu.matmul %6, %7, %cst_9 {dimension_numbers = #tpu.dot_dimension_numbers<[1], [0], [0], [1], [0, 0, 1, 1], [], []>} : vector<16x32xf32>, vector<32x96xf32>, vector<16x96xf32> -> vector<16x96xf32>
    %c0_10 = arith.constant 0 : index
    %c0_11 = arith.constant 0 : index
    %9 = vector.load %arg6[%c0_10, %c0_11] : memref<1x96xf32, #tpu.memory_space<vmem>>, vector<1x96xf32>
    %10 = vector.broadcast %9 : vector<1x96xf32> to vector<16x96xf32>
    %11 = arith.addf %8, %10 : vector<16x96xf32>
    %c0_12 = arith.constant 0 : index
    %c0_13 = arith.constant 0 : index
    %12 = vector.load %arg2[%c0_12, %c0_13] : memref<16x32xf32, #tpu.memory_space<vmem>>, vector<16x32xf32>
    %c0_14 = arith.constant 0 : index
    %c0_15 = arith.constant 0 : index
    %13 = vector.load %arg7[%c0_14, %c0_15] : memref<32x96xf32, #tpu.memory_space<vmem>>, vector<32x96xf32>
    %cst_16 = arith.constant dense<0.000000e+00> : vector<16x96xf32>
    %14 = tpu.matmul %12, %13, %cst_16 {dimension_numbers = #tpu.dot_dimension_numbers<[1], [0], [0], [1], [0, 0, 1, 1], [], []>} : vector<16x32xf32>, vector<32x96xf32>, vector<16x96xf32> -> vector<16x96xf32>
    %c0_17 = arith.constant 0 : index
    %c0_18 = arith.constant 0 : index
    %15 = vector.load %arg8[%c0_17, %c0_18] : memref<1x96xf32, #tpu.memory_space<vmem>>, vector<1x96xf32>
    %16 = vector.broadcast %15 : vector<1x96xf32> to vector<16x96xf32>
    %17 = arith.addf %14, %16 : vector<16x96xf32>
    %cst_19 = arith.constant 3.125000e-02 : f32
    %18 = vector.broadcast %cst_19 : f32 to vector<16x96xf32>
    %19 = arith.mulf %5, %18 : vector<16x96xf32>
    %20 = vector.shape_cast %19 : vector<16x96xf32> to vector<2x8x96xf32>
    %21 = vector.shape_cast %11 : vector<16x96xf32> to vector<2x8x96xf32>
    %22 = vector.shape_cast %17 : vector<16x96xf32> to vector<2x8x96xf32>
    %23 = vector.extract_strided_slice %20 {offsets = [0, 0, 0], sizes = [2, 8, 32], strides = [1, 1, 1]} : vector<2x8x96xf32> to vector<2x8x32xf32>
    %24 = vector.extract_strided_slice %21 {offsets = [0, 0, 0], sizes = [2, 8, 32], strides = [1, 1, 1]} : vector<2x8x96xf32> to vector<2x8x32xf32>
    %25 = vector.extract_strided_slice %22 {offsets = [0, 0, 0], sizes = [2, 8, 32], strides = [1, 1, 1]} : vector<2x8x96xf32> to vector<2x8x32xf32>
    %cst_20 = arith.constant dense<0.000000e+00> : vector<2x8x8xf32>
    %26 = tpu.matmul %23, %24, %cst_20 {dimension_numbers = #tpu.dot_dimension_numbers<[2], [2], [1], [1], [0, 0, 0, 1, 1, 1], [0], [0]>} : vector<2x8x32xf32>, vector<2x8x32xf32>, vector<2x8x8xf32> -> vector<2x8x8xf32>
    %cst_21 = arith.constant dense<0xFF800000> : vector<8x8xf32>
    %27 = vector.multi_reduction <maximumf>, %26, %cst_21 [0] : vector<2x8x8xf32> to vector<8x8xf32>
    %28 = vector.shape_cast %27 : vector<8x8xf32> to vector<1x8x8xf32>
    %29 = vector.broadcast %28 : vector<1x8x8xf32> to vector<2x8x8xf32>
    %30 = arith.subf %26, %29 : vector<2x8x8xf32>
    %31 = math.exp %30 : vector<2x8x8xf32>
    %cst_22 = arith.constant dense<0.000000e+00> : vector<8x8xf32>
    %32 = vector.multi_reduction <add>, %31, %cst_22 [0] : vector<2x8x8xf32> to vector<8x8xf32>
    %33 = vector.shape_cast %32 : vector<8x8xf32> to vector<1x8x8xf32>
    %34 = vector.broadcast %33 : vector<1x8x8xf32> to vector<2x8x8xf32>
    %35 = arith.divf %31, %34 : vector<2x8x8xf32>
    %cst_23 = arith.constant dense<0.000000e+00> : vector<2x8x32xf32>
    %36 = tpu.matmul %35, %25, %cst_23 {dimension_numbers = #tpu.dot_dimension_numbers<[2], [1], [1], [2], [0, 0, 0, 1, 1, 2], [0], [0]>} : vector<2x8x8xf32>, vector<2x8x32xf32>, vector<2x8x32xf32> -> vector<2x8x32xf32>
    %37 = vector.shape_cast %36 : vector<2x8x32xf32> to vector<16x32xf32>
    %38 = vector.extract_strided_slice %20 {offsets = [0, 0, 32], sizes = [2, 8, 32], strides = [1, 1, 1]} : vector<2x8x96xf32> to vector<2x8x32xf32>
    %39 = vector.extract_strided_slice %21 {offsets = [0, 0, 32], sizes = [2, 8, 32], strides = [1, 1, 1]} : vector<2x8x96xf32> to vector<2x8x32xf32>
    %40 = vector.extract_strided_slice %22 {offsets = [0, 0, 32], sizes = [2, 8, 32], strides = [1, 1, 1]} : vector<2x8x96xf32> to vector<2x8x32xf32>
    %cst_24 = arith.constant dense<0.000000e+00> : vector<2x8x8xf32>
    %41 = tpu.matmul %38, %39, %cst_24 {dimension_numbers = #tpu.dot_dimension_numbers<[2], [2], [1], [1], [0, 0, 0, 1, 1, 1], [0], [0]>} : vector<2x8x32xf32>, vector<2x8x32xf32>, vector<2x8x8xf32> -> vector<2x8x8xf32>
    %cst_25 = arith.constant dense<0xFF800000> : vector<8x8xf32>
    %42 = vector.multi_reduction <maximumf>, %41, %cst_25 [0] : vector<2x8x8xf32> to vector<8x8xf32>
    %43 = vector.shape_cast %42 : vector<8x8xf32> to vector<1x8x8xf32>
    %44 = vector.broadcast %43 : vector<1x8x8xf32> to vector<2x8x8xf32>
    %45 = arith.subf %41, %44 : vector<2x8x8xf32>
    %46 = math.exp %45 : vector<2x8x8xf32>
    %cst_26 = arith.constant dense<0.000000e+00> : vector<8x8xf32>
    %47 = vector.multi_reduction <add>, %46, %cst_26 [0] : vector<2x8x8xf32> to vector<8x8xf32>
    %48 = vector.shape_cast %47 : vector<8x8xf32> to vector<1x8x8xf32>
    %49 = vector.broadcast %48 : vector<1x8x8xf32> to vector<2x8x8xf32>
    %50 = arith.divf %46, %49 : vector<2x8x8xf32>
    %cst_27 = arith.constant dense<0.000000e+00> : vector<2x8x32xf32>
    %51 = tpu.matmul %50, %40, %cst_27 {dimension_numbers = #tpu.dot_dimension_numbers<[2], [1], [1], [2], [0, 0, 0, 1, 1, 2], [0], [0]>} : vector<2x8x8xf32>, vector<2x8x32xf32>, vector<2x8x32xf32> -> vector<2x8x32xf32>
    %52 = vector.shape_cast %51 : vector<2x8x32xf32> to vector<16x32xf32>
    %53 = vector.extract_strided_slice %20 {offsets = [0, 0, 64], sizes = [2, 8, 32], strides = [1, 1, 1]} : vector<2x8x96xf32> to vector<2x8x32xf32>
    %54 = vector.extract_strided_slice %21 {offsets = [0, 0, 64], sizes = [2, 8, 32], strides = [1, 1, 1]} : vector<2x8x96xf32> to vector<2x8x32xf32>
    %55 = vector.extract_strided_slice %22 {offsets = [0, 0, 64], sizes = [2, 8, 32], strides = [1, 1, 1]} : vector<2x8x96xf32> to vector<2x8x32xf32>
    %cst_28 = arith.constant dense<0.000000e+00> : vector<2x8x8xf32>
    %56 = tpu.matmul %53, %54, %cst_28 {dimension_numbers = #tpu.dot_dimension_numbers<[2], [2], [1], [1], [0, 0, 0, 1, 1, 1], [0], [0]>} : vector<2x8x32xf32>, vector<2x8x32xf32>, vector<2x8x8xf32> -> vector<2x8x8xf32>
    %cst_29 = arith.constant dense<0xFF800000> : vector<8x8xf32>
    %57 = vector.multi_reduction <maximumf>, %56, %cst_29 [0] : vector<2x8x8xf32> to vector<8x8xf32>
    %58 = vector.shape_cast %57 : vector<8x8xf32> to vector<1x8x8xf32>
    %59 = vector.broadcast %58 : vector<1x8x8xf32> to vector<2x8x8xf32>
    %60 = arith.subf %56, %59 : vector<2x8x8xf32>
    %61 = math.exp %60 : vector<2x8x8xf32>
    %cst_30 = arith.constant dense<0.000000e+00> : vector<8x8xf32>
    %62 = vector.multi_reduction <add>, %61, %cst_30 [0] : vector<2x8x8xf32> to vector<8x8xf32>
    %63 = vector.shape_cast %62 : vector<8x8xf32> to vector<1x8x8xf32>
    %64 = vector.broadcast %63 : vector<1x8x8xf32> to vector<2x8x8xf32>
    %65 = arith.divf %61, %64 : vector<2x8x8xf32>
    %cst_31 = arith.constant dense<0.000000e+00> : vector<2x8x32xf32>
    %66 = tpu.matmul %65, %55, %cst_31 {dimension_numbers = #tpu.dot_dimension_numbers<[2], [1], [1], [2], [0, 0, 0, 1, 1, 2], [0], [0]>} : vector<2x8x8xf32>, vector<2x8x32xf32>, vector<2x8x32xf32> -> vector<2x8x32xf32>
    %67 = vector.shape_cast %66 : vector<2x8x32xf32> to vector<16x32xf32>
    %68 = tpu.concatenate %37, %52, %67 in 1 : vector<16x32xf32>, vector<16x32xf32>, vector<16x32xf32> -> vector<16x96xf32>
    %c0_32 = arith.constant 0 : index
    %c0_33 = arith.constant 0 : index
    %69 = vector.load %arg9[%c0_32, %c0_33] : memref<96x32xf32, #tpu.memory_space<vmem>>, vector<96x32xf32>
    %cst_34 = arith.constant dense<0.000000e+00> : vector<16x32xf32>
    %70 = tpu.matmul %68, %69, %cst_34 {dimension_numbers = #tpu.dot_dimension_numbers<[1], [0], [0], [1], [0, 0, 1, 1], [], []>} : vector<16x96xf32>, vector<96x32xf32>, vector<16x32xf32> -> vector<16x32xf32>
    %c0_35 = arith.constant 0 : index
    %c0_36 = arith.constant 0 : index
    %71 = vector.load %arg10[%c0_35, %c0_36] : memref<1x32xf32, #tpu.memory_space<vmem>>, vector<1x32xf32>
    %72 = vector.broadcast %71 : vector<1x32xf32> to vector<16x32xf32>
    %73 = arith.addf %70, %72 : vector<16x32xf32>
    %c0_37 = arith.constant 0 : index
    %c0_38 = arith.constant 0 : index
    %74 = vector.load %arg11[%c0_37, %c0_38] : memref<16x32xf32, #tpu.memory_space<vmem>>, vector<16x32xf32>
    tpu.vector_store %arg11[%c0_37, %c0_38], %73 {strides = array<i32>} : memref<16x32xf32, #tpu.memory_space<vmem>>, vector<16x32xf32>,
    return
  }
}

</mosaic_0001>

<bundles_post_ra>
// kernel: tpu_custom_call.1
= control target key start
LH: loop header
LB: loop body
LE: loop exit
PB: predicated region body
PF: predicated region fallthrough
CT: control target
= control target key end

     0   :  { %16 = vsyncpa [#allocation3], 0  ;;  %s1985_s0 = inlined_call_operand.vmem [shape: f32[16,32], index: 0, kind: input, shape index: {}]   ;;  %s1986_s1 = inlined_call_operand.vmem [shape: f32[16,32], index: 1, kind: input, shape index: {}]   ;;  %s1987_s2 = inlined_call_operand.hbm [shape: f32[16,32], index: 2, kind: input, shape index: {}]   ;;  %s1988_s3 = inlined_call_operand.vmem [shape: f32[32,96], index: 3, kind: input, shape index: {}]   ;;  %s1989_s4 = inlined_call_operand.vmem [shape: f32[1,96], index: 4, kind: input, shape index: {}]   ;;  %s1990_s5 = inlined_call_operand.vmem [shape: f32[32,96], index: 5, kind: input, shape index: {}]   ;;  %s1991_s6 = inlined_call_operand.vmem [shape: f32[1,96], index: 6, kind: input, shape index: {}]   ;;  %s1992_s7 = inlined_call_operand.vmem [shape: f32[32,96], index: 7, kind: input, shape index: {}]   ;;  %s1993_s8 = inlined_call_operand.vmem [shape: f32[1,96], index: 8, kind: input, shape index: {}]   ;;  %s1994_s9 = inlined_call_operand.vmem [shape: f32[96,32], index: 9, kind: input, shape index: {}]   ;;  %s1995_s10 = inlined_call_operand.vmem [shape: f32[1,32], index: 10, kind: input, shape index: {}]   ;;  %s1996_s11 = inlined_call_operand.hbm [shape: f32[16,32], index: 11, kind: output, shape index: {}]  }
   0x1   :  { %17 = vsyncpa [#allocation4], 0  ;;  %s1718_s17 = smov [#allocation2]  }
   0x2   :  { %s27_s18 = sshll.u32 %s1718_s17, 4  ;;  %s28_s18 = int_to_ptr.vmem [resolvable:$true] %s27_s18 }
   0x3   :  { %s1682_s19 = scalar_lea.vmem %s28_s18, 256  ;;  %p1687_p1 = scmp.lt.s32.totalorder %s28_s18, %s28_s18 }
   0x4   :  { %p1683_p0 = scmp.ne.s32.totalorder %s28_s18, %s1682_s19  ;;  %p1688_p2 = scmp.lt.s32.totalorder %s1682_s19, %s1682_s19 }
   0x6   :  { %p1689_p3 = por %p1688_p2, %p1687_p1 }
   0x8   :  { %p1690_p4 = pnand %p1689_p3, %p1683_p0 }
   0xa   :  { %1693 = shalt.err (!%p1690_p4)
}
   0xb   :  { %s1719_s20 = smov 128   ;;  %s1720_s21 = smov 8  }
   0xc   :  { %33 = dma.hbm_to_vmem [thread:$0]  %s1987_s2, 256, %s28_s18, [#allocation3], %s1719_s20, %s1719_s20, %s1720_s21  }
   0xd   :  { %1714 = dma.done.wait [#allocation3], 256  }
   0xe   :  { %1715 = vsyncadd [#allocation3], 4294967040  ;;  %vm66_vm0 = vcmask 261120   ;;  %v58_v0 = vld [vmem:[%s1988_s3 + $0x18] sm:$0xff]  ;;  %v57_v1 = vld [vmem:[%s1988_s3 + $0x10] sm:$0xff]  ;;  %v1721_v18 = vmov 0.0  }
   0xf   :  { %1527 = vmatprep.subr.mxu1 %v58_v0  ;;  %v53_v2 = vld [vmem:[%s1985_s0] sm:$0xff]  ;;  %v56_v3 = vld [vmem:[%s1988_s3 + $0x8] sm:$0xff]  ;;  %v247_v4 = vld [vmem:[%s1992_s7 + $0x18] sm:$0xff]  ;;  %vm1722_vm1 = vmmov 0   ;;  %s1723_s15 = smov 96   ;;  %vm490_vm2 = vcmask 64512  }
  0x10   :  { %1528 = vmatpush3.msra.mxu1 %v58_v0  ;;  %1535 = vmatprep.mubr.msk.f32.mxu1 %vm66_vm0, %v53_v2  ;;  %v246_v5 = vld [vmem:[%s1992_s7 + $0x10] sm:$0xff]  ;;  %v55_v6 = vld [vmem:[%s1988_s3] sm:$0xff]  ;;  %v245_v7 = vld [vmem:[%s1992_s7 + $0x8] sm:$0xff]  ;;  %vm1318_vm3 = vcmask 523264   ;;  %vm1340_vm4 = vcmask 785408  }
  0x11   :  { %1529 = vmatprep.subr.mxu1 %v57_v1  ;;  %1549 = vmatprep.subr.mxu0 %v247_v4  ;;  %v54_v8 = vld [vmem:[%s1985_s0 + $0x8] sm:$0xff]  ;;  %v153_v9 = vld [vmem:[%s1990_s5 + $0x18] sm:$0xff]  ;;  %v148_v10 = vld [vmem:[%s1986_s1] sm:$0xff] }
  0x12   :  { %1530 = vmatpush3.msra.mxu1 %v57_v1  ;;  %1550 = vmatpush3.msra.mxu0 %v247_v4  ;;  %v152_v11 = vld [vmem:[%s1990_s5 + $0x10] sm:$0xff]  ;;  %v244_v12 = vld [vmem:[%s1992_s7] sm:$0xff]  ;;  %v151_v13 = vld [vmem:[%s1990_s5 + $0x8] sm:$0xff] }
  0x13   :  { %1531 = vmatprep.subr.mxu1 %v56_v3  ;;  %1551 = vmatprep.subr.mxu0 %v246_v5  ;;  %v242_v14 = vld [vmem:[#allocation2] sm:$0xff]  ;;  %v243_v16 = vld [vmem:[#allocation2 + $0x8] sm:$0xff] }
  0x14   :  { %1532 = vmatpush3.msra.mxu1 %v56_v3  ;;  %1552 = vmatpush3.msra.mxu0 %v246_v5  ;;  %v150_v15 = vld [vmem:[%s1990_s5] sm:$0xff]  ;;  %v149_v17 = vld [vmem:[%s1986_s1 + $0x8] sm:$0xff] }
  0x15   :  { %1533 = vmatprep.subr.mxu1 %v55_v6  ;;  %1553 = vmatprep.subr.mxu0 %v245_v7  ;;  %v1441_v20 = vld [vmem:[%s1989_s4] ss:$0 sm:$0xff]  ;;  %s1724_s4 = smov 64  }
  0x16   :  { %1534 = vmatpush3.msra.mxu1 %v55_v6  ;;  %1554 = vmatpush3.msra.mxu0 %v245_v7  ;;  %v1447_v27 = vld [vmem:[%s1993_s8] ss:$0 sm:$0xff] }
  0x17   :  { %1536 = vmatmul.mubr.msk.f32.vlgmr.msra.gmra.mxu1 %vm66_vm0, %v54_v8  ;;  %1538 = vmatprep.subr.mxu1 %v153_v9  ;;  %v1444_v29 = vld [vmem:[%s1991_s6] ss:$0 sm:$0xff]  ;;  %s1725_s6 = smov 32  }
  0x18   :  { %1539 = vmatpush3.msra.mxu1 %v153_v9  ;;  %1546 = vmatprep.mubr.msk.f32.mxu1 %vm66_vm0, %v148_v10 }
  0x19   :  { %1540 = vmatprep.subr.mxu1 %v152_v11  ;;  %1555 = vmatprep.subr.mxu0 %v244_v12 }
  0x1a   :  { %1541 = vmatpush3.msra.mxu1 %v152_v11  ;;  %1556 = vmatpush3.msra.mxu0 %v244_v12 }
  0x1b   :  { %1542 = vmatprep.subr.mxu1 %v151_v13  ;;  %1557 = vmatprep.mubr.msk.f32.mxu0 %vm66_vm0, %v242_v14 }
  0x1c   :  { %1543 = vmatpush3.msra.mxu1 %v151_v13  ;;  %1558 = vmatmul.mubr.msk.f32.vlgmr.msra.gmra.mxu0 %vm66_vm0, %v243_v16 }
  0x1d   :  { %1544 = vmatprep.subr.mxu1 %v150_v15  ;;  %1580 = vmatprep.subr.mxu0 %v1721_v18 }
  0x1e   :  { %1545 = vmatpush3.msra.mxu1 %v150_v15  ;;  %1582 = vmatprep.mubr.msk.f32.mxu0 %vm1722_vm1, %v1721_v18 }
  0x1f   :  { %1547 = vmatmul.mubr.msk.f32.vlgmr.msra.gmra.mxu1 %vm66_vm0, %v149_v17  ;;  %1560 = vmatprep.subr.mxu1 %v1721_v18 }
  0x20   :  { %1562 = vmatprep.mubr.msk.f32.mxu1 %vm1722_vm1, %v1721_v18 }
  0xd7   :  { %v1537_v19 = vpop.f32.mrf.mxu1 }
  0xd8   :  { %v145_v23 = vadd.f32 %v1537_v19, %v1441_v20 }
  0xd9   :  { %v139_v21 = vpop.f32.mrf.mxu1 }
  0xda   :  { %v140_v22 = vadd.f32 %v1441_v20, %v139_v21  ;;  %v337_v28 = vmul.f32 0.03125, %v145_v23 }
  0xdc   :  { %v336_v24 = vmul.f32 0.03125, %v140_v22  ;;  %v1559_v26 = vpop.f32.mrf.mxu0 }
  0xdd   :  { %v333_v32 = vadd.f32 %v1559_v26, %v1447_v27 }
  0xde   :  { %652 = vrot.lane.b32.xlu1 %v336_v24, %s1723_s15  ;;  %v327_v33 = vpop.f32.mrf.mxu0 }
  0xdf   :  { %v1548_v25 = vpop.f32.mrf.mxu1  ;;  %v328_v35 = vadd.f32 %v1447_v27, %v327_v33 }
  0xe0   :  { %v239_v34 = vadd.f32 %v1548_v25, %v1444_v29 }
  0xe1   :  { %v233_v30 = vpop.f32.mrf.mxu1 }
  0xe2   :  { %v234_v31 = vadd.f32 %v1444_v29, %v233_v30  ;;  %730 = vrot.lane.b32.xlu1 %v337_v28, %s1723_s15 }
  0xe4   :  { %654 = vrot.lane.b32.xlu0 %v234_v31, %s1723_s15  ;;  %1561 = vmatpush3.xpose.msk.msra.mxu1 %vm66_vm0, %v234_v31 }
  0xe5   :  { %1565 = vmatprep.subr.mxu1 %v1721_v18 }
  0xe6   :  { %901 = vrot.lane.b32.xlu1 %v333_v32, %s1723_s15 }
  0xe7   :  { %1563 = vmatmul.mubr.msk.f32.vlgmr.msra.gmra.mxu1 %vm66_vm0, %v336_v24 }
  0xe8   :  { %732 = vrot.lane.b32.xlu0 %v239_v34, %s1723_s15  ;;  %1566 = vmatpush3.xpose.msk.msra.mxu1 %vm66_vm0, %v239_v34 }
  0xe9   :  { %1567 = vmatprep.mubr.msk.f32.mxu1 %vm1722_vm1, %v1721_v18  ;;  %1570 = vmatprep.subr.mxu1 %v1721_v18 }
  0xea   :  { %1057 = vrot.lane.b32.xlu1 %v239_v34, %s1724_s4 }
  0xeb   :  { %1568 = vmatmul.mubr.msk.f32.vlgmr.msra.gmra.mxu1 %vm66_vm0, %v337_v28 }
  0xec   :  { %824 = vrot.lane.b32.xlu0 %v328_v35, %s1723_s15  ;;  %1571 = vmatpush3.msra.mxu1 %v328_v35 }
  0xed   :  { %1572 = vmatprep.mubr.msk.f32.mxu1 %vm1722_vm1, %v1721_v18  ;;  %1575 = vmatprep.subr.mxu1 %v1721_v18 }
  0xee   :  { %1055 = vrot.lane.b32.xlu1 %v337_v28, %s1724_s4 }
  0xf0   :  { %979 = vrot.lane.b32.xlu0 %v234_v31, %s1724_s4 }
  0xf2   :  { %1224 = vrot.lane.b32.xlu1 %v333_v32, %s1724_s4 }
  0xf4   :  { %977 = vrot.lane.b32.xlu0 %v336_v24, %s1724_s4 }
  0xf8   :  { %1148 = vrot.lane.b32.xlu0 %v328_v35, %s1724_s4 }
 0x150   :  { %v653_v37 = vpop.permute.xlu1 %652 }
 0x154   :  { %v731_v58 = vpop.permute.xlu1 %730 }
 0x156   :  { %v655_v36 = vpop.permute.xlu0 %654 }
 0x157   :  { %1581 = vmatpush3.xpose.msk.msra.mxu0 %vm66_vm0, %v655_v36 }
 0x158   :  { %1590 = vmatprep.subr.mxu0 %v1721_v18  ;;  %v902_v60 = vpop.permute.xlu1 %901 }
 0x15a   :  { %v733_v38 = vpop.permute.xlu0 %732  ;;  %1583 = vmatmul.mubr.msk.f32.vlgmr.msra.gmra.mxu0 %vm66_vm0, %v653_v37 }
 0x15b   :  { %1592 = vmatprep.mubr.msk.f32.mxu0 %vm1722_vm1, %v1721_v18 }
 0x15c   :  { %v1058_v17 = vpop.permute.xlu1 %1057 }
 0x15e   :  { %v825_v39 = vpop.permute.xlu0 %824 }
 0x15f   :  { %1591 = vmatpush3.msra.mxu0 %v825_v39 }
 0x160   :  { %1600 = vmatprep.subr.mxu0 %v1721_v18  ;;  %v1056_v23 = vpop.permute.xlu1 %1055 }
 0x162   :  { %v980_v19 = vpop.permute.xlu0 %979 }
 0x164   :  { %v1225_v26 = vpop.permute.xlu1 %1224 }
 0x166   :  { %v978_v24 = vpop.permute.xlu0 %977 }
 0x16a   :  { %v1149_v25 = vpop.permute.xlu0 %1148 }
 0x1a7   :  { %v410_v40 = vpop.f32.mrf.mxu1 }
 0x1a8   :  { %v491_v43 = vsel %vm490_vm2, %v410_v40, -inf }
 0x1a9   :  { %v1564_v41 = vpop.f32.mrf.mxu1 }
 0x1ab   :  { %v486_v42 = vpop.f32.mrf.mxu1 }
 0x1ac   :  { %v492_v44 = vsel %vm490_vm2, %v486_v42, -inf }
 0x1ad   :  { %v493_v45 = vmax.f32 %v491_v43, %v492_v44  ;;  %v1569_v46 = vpop.f32.mrf.mxu1 }
 0x1af   :  { %v494_v47 = vsub.f32 %v410_v40, %v493_v45  ;;  %v495_v48 = vsub.f32 %v486_v42, %v493_v45 }
 0x1b1   :  { %v496_v49 = vmul.f32 1.442695, %v494_v47  ;;  %v498_v50 = vmul.f32 1.442695, %v495_v48 }
 0x1b3   :  { %1656 = vpow2.f32 %v496_v49  ;;  %v1332_v49 = vld [vmem:[%s1994_s9 + $0x58] sm:$0xff] }
 0x1b4   :  { %1658 = vpow2.f32 %v498_v50  ;;  %v1331_v50 = vld [vmem:[%s1994_s9 + $0x50] sm:$0xff] }
 0x1c0   :  { %v1657_v51 = vpop.eup %1656 }
 0x1c1   :  { %v1659_v52 = vpop.eup %1658  ;;  %v500_v53 = vsel %vm490_vm2, %v1657_v51, 0.0 }
 0x1c2   :  { %v501_v54 = vsel %vm490_vm2, %v1659_v52, 0.0 }
 0x1c3   :  { %v502_v55 = vadd.f32 %v501_v54, %v500_v53  ;;  %v1328_v53 = vld [vmem:[%s1994_s9 + $0x38] sm:$0xff]  ;;  %v1327_v54 = vld [vmem:[%s1994_s9 + $0x30] sm:$0xff] }
 0x1c5   :  { %1660 = vrcp.f32 %v502_v55  ;;  %v1326_v55 = vld [vmem:[%s1994_s9 + $0x28] sm:$0xff] }
 0x1d2   :  { %v1661_v56 = vpop.eup %1660 }
 0x1d3   :  { %v504_v57 = vmul.f32 %v1661_v56, %v1657_v51  ;;  %v505_v59 = vmul.f32 %v1661_v56, %v1659_v52  ;;  %v1330_v51 = vld [vmem:[%s1994_s9 + $0x48] sm:$0xff]  ;;  %v1329_v52 = vld [vmem:[%s1994_s9 + $0x40] sm:$0xff] }
 0x1d4   :  { %v1325_v56 = vld [vmem:[%s1994_s9 + $0x20] sm:$0xff] }
 0x1d5   :  { %1573 = vmatmul.mubr.msk.f32.vlgmr.msra.gmra.mxu1 %vm490_vm2, %v504_v57  ;;  %v1324_v57 = vld [vmem:[%s1994_s9 + $0x18] sm:$0xff] }
 0x1d6   :  { %1576 = vmatpush3.msra.mxu1 %v333_v32  ;;  %1577 = vmatprep.mubr.msk.f32.mxu1 %vm1722_vm1, %v1721_v18 }
 0x1d7   :  { %1585 = vmatprep.subr.mxu1 %v1721_v18 }
 0x1d9   :  { %1578 = vmatmul.mubr.msk.f32.vlgmr.msra.gmra.mxu1 %vm490_vm2, %v505_v59  ;;  %v1322_v59 = vld [vmem:[%s1994_s9 + $0x8] sm:$0xff] }
 0x1da   :  { %1586 = vmatpush3.xpose.msk.msra.mxu1 %vm66_vm0, %v733_v38  ;;  %1587 = vmatprep.mubr.msk.f32.mxu1 %vm1722_vm1, %v1721_v18 }
 0x1db   :  { %1595 = vmatprep.subr.mxu1 %v1721_v18 }
 0x1dd   :  { %1588 = vmatmul.mubr.msk.f32.vlgmr.msra.gmra.mxu1 %vm66_vm0, %v731_v58  ;;  %v1323_v58 = vld [vmem:[%s1994_s9 + $0x10] sm:$0xff] }
 0x1de   :  { %1596 = vmatpush3.msra.mxu1 %v902_v60  ;;  %1597 = vmatprep.mubr.msk.f32.mxu1 %vm1722_vm1, %v1721_v18  ;;  %v1321_v60 = vld [vmem:[%s1994_s9] sm:$0xff] }
 0x1df   :  { %1605 = vmatprep.subr.mxu1 %v1721_v18 }
 0x21a   :  { %v726_v61 = vpop.f32.mrf.mxu0 }
 0x21b   :  { %v808_v4 = vsel %vm490_vm2, %v726_v61, -inf }
 0x21c   :  { %v1584_v62 = vpop.f32.mrf.mxu0 }
 0x295   :  { %v1902_v63 = vpop.f32.mrf.mxu1 }
 0x297   :  { %v1574_v0 = vpop.f32.mrf.mxu1 }
 0x299   :  { %v1904_v1 = vpop.f32.mrf.mxu1 }
 0x29b   :  { %v1579_v2 = vpop.f32.mrf.mxu1 }
 0x29d   :  { %v804_v3 = vpop.f32.mrf.mxu1 }
 0x29e   :  { %v809_v5 = vsel %vm490_vm2, %v804_v3, -inf }
 0x29f   :  { %v810_v6 = vmax.f32 %v808_v4, %v809_v5  ;;  %v1589_v7 = vpop.f32.mrf.mxu1 }
 0x2a1   :  { %v811_v8 = vsub.f32 %v726_v61, %v810_v6  ;;  %v812_v9 = vsub.f32 %v804_v3, %v810_v6 }
 0x2a3   :  { %v813_v10 = vmul.f32 1.442695, %v811_v8  ;;  %v815_v11 = vmul.f32 1.442695, %v812_v9 }
 0x2a5   :  { %1662 = vpow2.f32 %v813_v10 }
 0x2a6   :  { %1664 = vpow2.f32 %v815_v11  ;;  %v1468_v11 = vld [vmem:[%s1995_s10] ss:$0 sm:$0xff] }
 0x2b2   :  { %v1663_v12 = vpop.eup %1662 }
 0x2b3   :  { %v1665_v13 = vpop.eup %1664  ;;  %v817_v14 = vsel %vm490_vm2, %v1663_v12, 0.0 }
 0x2b4   :  { %v818_v15 = vsel %vm490_vm2, %v1665_v13, 0.0 }
 0x2b5   :  { %v819_v16 = vadd.f32 %v818_v15, %v817_v14 }
 0x2b7   :  { %1666 = vrcp.f32 %v819_v16 }
 0x2c4   :  { %v1667_v20 = vpop.eup %1666 }
 0x2c5   :  { %v821_v21 = vmul.f32 %v1667_v20, %v1663_v12  ;;  %v822_v22 = vmul.f32 %v1667_v20, %v1665_v13 }
 0x2c7   :  { %1593 = vmatmul.mubr.msk.f32.vlgmr.msra.gmra.mxu0 %vm490_vm2, %v821_v21  ;;  %1598 = vmatmul.mubr.msk.f32.vlgmr.msra.gmra.mxu1 %vm490_vm2, %v822_v22 }
 0x2c8   :  { %1601 = vmatpush3.xpose.msk.msra.mxu0 %vm66_vm0, %v980_v19  ;;  %1606 = vmatpush3.xpose.msk.msra.mxu1 %vm66_vm0, %v1058_v17 }
 0x2c9   :  { %1602 = vmatprep.mubr.msk.f32.mxu0 %vm1722_vm1, %v1721_v18  ;;  %1607 = vmatprep.mubr.msk.f32.mxu1 %vm1722_vm1, %v1721_v18 }
 0x2ca   :  { %1610 = vmatprep.subr.mxu0 %v1721_v18  ;;  %1615 = vmatprep.subr.mxu1 %v1721_v18 }
 0x2cb   :  { %1603 = vmatmul.mubr.msk.f32.vlgmr.msra.gmra.mxu0 %vm66_vm0, %v978_v24  ;;  %1608 = vmatmul.mubr.msk.f32.vlgmr.msra.gmra.mxu1 %vm66_vm0, %v1056_v23 }
 0x2cc   :  { %1611 = vmatpush3.msra.mxu0 %v1149_v25  ;;  %1616 = vmatpush3.msra.mxu1 %v1225_v26 }
 0x2cd   :  { %1612 = vmatprep.mubr.msk.f32.mxu0 %vm1722_vm1, %v1721_v18  ;;  %1617 = vmatprep.mubr.msk.f32.mxu1 %vm1722_vm1, %v1721_v18 }
 0x2ce   :  { %1620 = vmatprep.subr.mxu0 %v1332_v49 }
 0x387   :  { %v896_v27 = vpop.f32.mrf.mxu0  ;;  %v973_v28 = vpop.f32.mrf.mxu1 }
 0x388   :  { %1302 = vrot.lane.b32.xlu0 %v896_v27, %s1725_s6  ;;  %1304 = vrot.lane.b32.xlu1 %v973_v28, %s1725_s6  ;;  %s1726_s6 = smov [#allocation5]  }
 0x389   :  { %v1594_v29 = vpop.f32.mrf.mxu0  ;;  %v1599_v30 = vpop.f32.mrf.mxu1  ;;  %s1429_s8 = sshll.u32 %s1726_s6, 4  ;;  %s1430_s8 = int_to_ptr.vmem [resolvable:$true] %s1429_s8 }
 0x38a   :  { %s1694_s22 = scalar_lea.vmem %s1430_s8, 256  ;;  %p1699_p6 = scmp.lt.s32.totalorder %s1430_s8, %s1430_s8 }
 0x38b   :  { %v1051_v31 = vpop.f32.mrf.mxu0  ;;  %v1129_v32 = vpop.f32.mrf.mxu1  ;;  %p1695_p5 = scmp.ne.s32.totalorder %s1430_s8, %s1694_s22  ;;  %p1700_p7 = scmp.lt.s32.totalorder %s1694_s22, %s1694_s22 }
 0x38c   :  { %v1133_v33 = vsel %vm490_vm2, %v1051_v31, -inf  ;;  %v1134_v34 = vsel %vm490_vm2, %v1129_v32, -inf }
 0x38d   :  { %v1135_v35 = vmax.f32 %v1133_v33, %v1134_v34  ;;  %v1604_v36 = vpop.f32.mrf.mxu0  ;;  %v1609_v37 = vpop.f32.mrf.mxu1  ;;  %p1701_p8 = por %p1700_p7, %p1699_p6 }
 0x38f   :  { %v1136_v38 = vsub.f32 %v1051_v31, %v1135_v35  ;;  %v1137_v39 = vsub.f32 %v1129_v32, %v1135_v35  ;;  %p1702_p9 = pnand %p1701_p8, %p1695_p5 }
 0x391   :  { %v1138_v40 = vmul.f32 1.442695, %v1136_v38  ;;  %v1140_v18 = vmul.f32 1.442695, %v1137_v39 }
 0x393   :  { %1668 = vpow2.f32 %v1138_v40 }
 0x394   :  { %1670 = vpow2.f32 %v1140_v18 }
 0x3a0   :  { %v1669_v41 = vpop.eup %1668 }
 0x3a1   :  { %v1671_v42 = vpop.eup %1670  ;;  %v1142_v43 = vsel %vm490_vm2, %v1669_v41, 0.0 }
 0x3a2   :  { %v1143_v44 = vsel %vm490_vm2, %v1671_v42, 0.0 }
 0x3a3   :  { %v1144_v45 = vadd.f32 %v1143_v44, %v1142_v43 }
 0x3a5   :  { %1672 = vrcp.f32 %v1144_v45 }
 0x3b2   :  { %v1673_v46 = vpop.eup %1672 }
 0x3b3   :  { %v1146_v47 = vmul.f32 %v1673_v46, %v1669_v41  ;;  %v1147_v48 = vmul.f32 %v1673_v46, %v1671_v42 }
 0x3b5   :  { %1613 = vmatmul.mubr.msk.f32.vlgmr.msra.gmra.mxu0 %vm490_vm2, %v1146_v47  ;;  %1618 = vmatmul.mubr.msk.f32.vlgmr.msra.gmra.mxu1 %vm490_vm2, %v1147_v48 }
 0x3b6   :  { %1621 = vmatpush3.msra.mxu0 %v1332_v49 }
 0x3b7   :  { %1622 = vmatprep.subr.mxu0 %v1331_v50 }
 0x3b8   :  { %1623 = vmatpush3.msra.mxu0 %v1331_v50 }
 0x3b9   :  { %1624 = vmatprep.subr.mxu0 %v1330_v51 }
 0x3ba   :  { %1625 = vmatpush3.msra.mxu0 %v1330_v51 }
 0x3bb   :  { %1626 = vmatprep.subr.mxu0 %v1329_v52 }
 0x3bc   :  { %1627 = vmatpush3.msra.mxu0 %v1329_v52 }
 0x3bd   :  { %1628 = vmatprep.subr.mxu0 %v1328_v53 }
 0x3be   :  { %1629 = vmatpush3.msra.mxu0 %v1328_v53 }
 0x3bf   :  { %1630 = vmatprep.subr.mxu0 %v1327_v54 }
 0x3c0   :  { %1631 = vmatpush3.msra.mxu0 %v1327_v54 }
 0x3c1   :  { %1632 = vmatprep.subr.mxu0 %v1326_v55 }
 0x3c2   :  { %1633 = vmatpush3.msra.mxu0 %v1326_v55 }
 0x3c3   :  { %1634 = vmatprep.subr.mxu0 %v1325_v56 }
 0x3c4   :  { %1635 = vmatpush3.msra.mxu0 %v1325_v56 }
 0x3c5   :  { %1636 = vmatprep.subr.mxu0 %v1324_v57 }
 0x3c6   :  { %1637 = vmatpush3.msra.mxu0 %v1324_v57 }
 0x3c7   :  { %1638 = vmatprep.subr.mxu0 %v1323_v58 }
 0x3c8   :  { %1639 = vmatpush3.msra.mxu0 %v1323_v58 }
 0x3c9   :  { %1640 = vmatprep.subr.mxu0 %v1322_v59 }
 0x3ca   :  { %1641 = vmatpush3.msra.mxu0 %v1322_v59 }
 0x3cb   :  { %1642 = vmatprep.subr.mxu0 %v1321_v60 }
 0x3cc   :  { %1643 = vmatpush3.msra.mxu0 %v1321_v60 }
 0x3fa   :  { %v1303_v3 = vpop.permute.xlu0 %1302  ;;  %v1305_v4 = vpop.permute.xlu1 %1304 }
 0x3fb   :  { %v1316_v5 = vsel %vm66_vm0, %v1902_v63, %v1303_v3  ;;  %v1317_v6 = vsel %vm66_vm0, %v1904_v1, %v1305_v4 }
 0x475   :  { %v1220_v61 = vpop.f32.mrf.mxu0  ;;  %v1296_v62 = vpop.f32.mrf.mxu1 }
 0x476   :  { %1310 = vrot.lane.b32.xlu0 %v1220_v61, %s1724_s4  ;;  %1312 = vrot.lane.b32.xlu1 %v1296_v62, %s1724_s4 }
 0x477   :  { %v1614_v0 = vpop.f32.mrf.mxu0  ;;  %v1619_v2 = vpop.f32.mrf.mxu1 }
 0x4e8   :  { %v1311_v7 = vpop.permute.xlu0 %1310  ;;  %v1313_v8 = vpop.permute.xlu1 %1312 }
 0x4e9   :  { %v1319_v9 = vsel %vm1318_vm3, %v1316_v5, %v1311_v7  ;;  %v1320_v10 = vsel %vm1318_vm3, %v1317_v6, %v1313_v8 }
 0x4ea   :  { %1644 = vmatprep.mubr.msk.f32.mxu0 %vm1340_vm4, %v1319_v9 }
 0x4eb   :  { %1645 = vmatmul.mubr.msk.f32.vlgmr.msra.gmra.mxu0 %vm1340_vm4, %v1320_v10 }
 0x5ab   :  { %v1646_v12 = vpop.f32.mrf.mxu0 }
 0x5ac   :  { %v1419_v13 = vadd.f32 %v1646_v12, %v1468_v11 }
 0x5ad   :  { %v1413_v14 = vpop.f32.mrf.mxu0 }
 0x5ae   :  { %1423 = vst.msk [vmem:[#allocation5 + $0x8] sm:$0xff] %vm66_vm0, %v1419_v13  ;;  %v1414_v63 = vadd.f32 %v1468_v11, %v1413_v14 }
 0x5b0   :  { %1422 = vst.msk [vmem:[#allocation5] sm:$0xff] %vm66_vm0, %v1414_v63 }
 0x5b1   :  { %1705 = shalt.err (!%p1702_p9)
}
 0x5b2   :  { %1435 = dma.vmem_to_hbm [thread:$0]  %s1430_s8, 256, %s1996_s11, [#allocation4], %s1719_s20, %s1719_s20, %s1720_s21  }
 0x5b3   :  { %1716 = dma.done.wait [#allocation4], 256  }
 0x5b4   :  { %1717 = vsyncadd [#allocation4], 4294967040 }
 0x5b5   :  { %1439 = vsyncpa [#allocation3], 1 }
 0x5b6   :  { %1440 = vsyncpa [#allocation4], 1 }

</bundles_post_ra>
